<compile_context>
chip_gen: v5e
topology: v5e:2x2
jax: 0.10.0
libtpu: 0.0.40
codegen_flags: <defaults>
</compile_context>

<pallas_src>
import jax
import jax.numpy as jnp
from jax.experimental import pallas as pl
from jax.experimental.pallas import tpu as pltpu


def _round_up(x, m):
    return (x + m - 1) // m * m


def wae_kernel(x_ref, eps_ref,
               w1_ref, b1_ref,
               wml_ref, bml_ref,
               w3_ref, b3_ref,
               w4_ref, b4_ref,
               out_ref):
    lat = eps_ref.shape[-1]
    input_dim = x_ref.shape[-1]
    pad = out_ref.shape[-1] - (3 * lat + input_dim)

    x = x_ref[...]
    eps = eps_ref[...]

    # encode: fc1 + relu  (bf16 MXU inputs, f32 accumulate / elementwise)
    h1 = jnp.dot(x.astype(jnp.bfloat16), w1_ref[...],
                 preferred_element_type=jnp.float32) + b1_ref[...]
    h1 = jnp.maximum(h1, 0.0)

    # fused fc2_mean | fc2_logvar: one MXU pass, one lane-contiguous [TB, 2*lat] result
    ml = jnp.dot(h1.astype(jnp.bfloat16), wml_ref[...],
                 preferred_element_type=jnp.float32) + bml_ref[...]
    mean = ml[:, :lat]
    logvar = ml[:, lat:]

    # reparameterize (eps supplied by caller, matches torch.randn_like semantics)
    z = mean + eps * jnp.exp(0.5 * logvar)

    # decode: fc3 + relu, fc4 + sigmoid (sigmoid -> EUP exp + cheap epilogue)
    h3 = jnp.dot(z.astype(jnp.bfloat16), w3_ref[...],
                 preferred_element_type=jnp.float32) + b3_ref[...]
    h3 = jnp.maximum(h3, 0.0)
    logits = jnp.dot(h3.astype(jnp.bfloat16), w4_ref[...],
                     preferred_element_type=jnp.float32) + b4_ref[...]
    recon = jax.nn.sigmoid(logits)

    # single lane-dense output slab: [mean|logvar | z | recon | zero-pad]
    # mean|logvar are already contiguous in ml, so this is a 3(+pad)-piece concat.
    pieces = [ml, z, recon]
    if pad > 0:
        pieces.append(jnp.zeros((x.shape[0], pad), jnp.float32))
    out_ref[...] = jnp.concatenate(pieces, axis=-1).astype(out_ref.dtype)


def _batch_tile(B):
    """Largest batch tile <= 512 dividing B; >= 2 grid steps when B > 256 (v7x megacore)."""
    if B <= 256:
        return B
    cap = min(512, B // 2)
    for tb in range(cap, 0, -1):
        if B % tb == 0:
            return tb
    return B  # unreachable


def wae_forward(x, eps, params, *, out_dtype=jnp.float32):
    """Run the fused WAE forward. Returns (z, recon, mean, logvar)."""
    B, input_dim = x.shape
    latent_dim = eps.shape[1]
    hidden_dim = params["w1"].shape[1]

    TB = _batch_tile(B)
    assert B % TB == 0  # TODO(synk): pad-and-mask ragged batches before shipping

    # One lane-dense output slab, padded to a multiple of 128 lanes -> unmasked stores.
    out_width = _round_up(3 * latent_dim + input_dim, 128)

    row_spec = lambda d: pl.BlockSpec((TB, d), lambda i: (i, 0))
    # Grid-invariant weights/biases: VMEM-resident across the grid, never re-fetched,
    # so single-buffer them to halve their resident footprint (matters on v7x 64 MiB/TC).
    pinned = lambda a: pl.BlockSpec(a.shape, lambda i: (0, 0),
                                    pipeline_mode=pl.Buffered(1))

    inputs = (x, eps,
              params["w1"], params["b1"],
              params["wml"], params["bml"],
              params["w3"], params["b3"],
              params["w4"], params["b4"])

    in_specs = [row_spec(input_dim), row_spec(latent_dim)] + [pinned(a) for a in inputs[2:]]
    out_specs = row_spec(out_width)
    out_shape = jax.ShapeDtypeStruct((B, out_width), out_dtype)

    flops = 2 * B * (input_dim * hidden_dim          # fc1
                     + hidden_dim * 2 * latent_dim   # fused fc2_mean|fc2_logvar
                     + latent_dim * hidden_dim       # fc3
                     + hidden_dim * input_dim)       # fc4
    bytes_accessed = (sum(int(a.size) * a.dtype.itemsize for a in inputs)
                      + B * out_width * jnp.dtype(out_dtype).itemsize)
    cost = pl.CostEstimate(flops=flops,
                           transcendentals=B * (latent_dim + input_dim),
                           bytes_accessed=bytes_accessed)

    out = pl.pallas_call(
        wae_kernel,
        out_shape=out_shape,
        grid=(B // TB,),
        in_specs=in_specs,
        out_specs=out_specs,
        compiler_params=pltpu.CompilerParams(
            dimension_semantics=("parallel",),          # megacore-shards rows on v7x
            vmem_limit_bytes=32 * 1024 * 1024),          # safe on v5e/v6e and v7x (64 MiB/TC)
        cost_estimate=cost,
    )(*inputs)

    mean = out[:, :latent_dim]
    logvar = out[:, latent_dim:2 * latent_dim]
    z = out[:, 2 * latent_dim:3 * latent_dim]
    recon = out[:, 3 * latent_dim:3 * latent_dim + input_dim]
    return z, recon, mean, logvar


def init_params(key, input_dim, latent_dim, hidden_dim):
    """PyTorch-style uniform(-1/sqrt(fan_in), 1/sqrt(fan_in)) init.
    Weights stored as [in, out] in bf16; fc2_mean/fc2_logvar pre-fused into wml/bml."""
    def linear(key, fan_in, fan_out):
        kw, kb = jax.random.split(key)
        bound = 1.0 / jnp.sqrt(float(fan_in))
        w = jax.random.uniform(kw, (fan_in, fan_out), jnp.float32, -bound, bound)
        b = jax.random.uniform(kb, (1, fan_out), jnp.float32, -bound, bound)
        return w, b

    k1, k2, k3, k4, k5 = jax.random.split(key, 5)
    w1, b1 = linear(k1, input_dim, hidden_dim)    # fc1
    wm, bm = linear(k2, hidden_dim, latent_dim)   # fc2_mean
    wl, bl = linear(k3, hidden_dim, latent_dim)   # fc2_logvar
    w3, b3 = linear(k4, latent_dim, hidden_dim)   # fc3
    w4, b4 = linear(k5, hidden_dim, input_dim)    # fc4

    bf16 = lambda w: w.astype(jnp.bfloat16)
    return dict(
        w1=bf16(w1), b1=b1,
        wml=bf16(jnp.concatenate([wm, wl], axis=1)),
        bml=jnp.concatenate([bm, bl], axis=1),
        w3=bf16(w3), b3=b3,
        w4=bf16(w4), b4=b4,
    )


if __name__ == "__main__":
    B, INPUT_DIM, LATENT_DIM, HIDDEN_DIM = 8, 32, 16, 64

    root = jax.random.PRNGKey(0)
    k_params, k_x, k_eps = jax.random.split(root, 3)

    params = init_params(k_params, INPUT_DIM, LATENT_DIM, HIDDEN_DIM)
    x = jax.random.normal(k_x, (B, INPUT_DIM), jnp.float32)
    eps = jax.random.normal(k_eps, (B, LATENT_DIM), jnp.float32)

    z, recon, mean, logvar = wae_forward(x, eps, params)
    jax.block_until_ready((z, recon, mean, logvar))

    # plain-JAX reference of the same (bf16-matmul, f32-accumulate) math
    def _dot(a, w):
        return jnp.dot(a.astype(jnp.bfloat16), w, preferred_element_type=jnp.float32)

    h1 = jnp.maximum(_dot(x, params["w1"]) + params["b1"], 0.0)
    ml = _dot(h1, params["wml"]) + params["bml"]
    mean_ref, logvar_ref = ml[:, :LATENT_DIM], ml[:, LATENT_DIM:]
    z_ref = mean_ref + eps * jnp.exp(0.5 * logvar_ref)
    h3 = jnp.maximum(_dot(z_ref, params["w3"]) + params["b3"], 0.0)
    recon_ref = jax.nn.sigmoid(_dot(h3, params["w4"]) + params["b4"])

    assert jnp.allclose(z, z_ref, atol=2e-3, rtol=2e-3)
    assert jnp.allclose(recon, recon_ref, atol=2e-3, rtol=2e-3)
    assert jnp.allclose(mean, mean_ref, atol=2e-3, rtol=2e-3)
    assert jnp.allclose(logvar, logvar_ref, atol=2e-3, rtol=2e-3)

    print("KERNEL_OK")
</pallas_src>

<mosaic_0001>
module attributes {stable_mosaic.version = 11 : i64} {
  func.func @wae_kernel(%arg0: i32, %arg1: memref<8x32xf32, #tpu.memory_space<vmem>>, %arg2: memref<8x16xf32, #tpu.memory_space<vmem>>, %arg3: memref<32x64xbf16, #tpu.memory_space<vmem>>, %arg4: memref<1x64xf32, #tpu.memory_space<vmem>>, %arg5: memref<64x32xbf16, #tpu.memory_space<vmem>>, %arg6: memref<1x32xf32, #tpu.memory_space<vmem>>, %arg7: memref<16x64xbf16, #tpu.memory_space<vmem>>, %arg8: memref<1x64xf32, #tpu.memory_space<vmem>>, %arg9: memref<64x32xbf16, #tpu.memory_space<vmem>>, %arg10: memref<1x32xf32, #tpu.memory_space<vmem>>, %arg11: memref<8x128xf32, #tpu.memory_space<vmem>>) attributes {dimension_semantics = [#tpu.dimension_semantics<parallel>], iteration_bounds = array<i64: 1>, scalar_prefetch = 0 : i64, scratch_operands = 0 : i64, tpu.core_type = #tpu.core_type<tc>, window_params = [{transform_indices = @transform_0, window_bounds = array<i64: 8, 32>}, {transform_indices = @transform_1, window_bounds = array<i64: 8, 16>}, {pipeline_mode = #tpu.pipeline_mode<synchronous>, transform_indices = @transform_2, window_bounds = array<i64: 32, 64>}, {pipeline_mode = #tpu.pipeline_mode<synchronous>, transform_indices = @transform_3, window_bounds = array<i64: 1, 64>}, {pipeline_mode = #tpu.pipeline_mode<synchronous>, transform_indices = @transform_4, window_bounds = array<i64: 64, 32>}, {pipeline_mode = #tpu.pipeline_mode<synchronous>, transform_indices = @transform_5, window_bounds = array<i64: 1, 32>}, {pipeline_mode = #tpu.pipeline_mode<synchronous>, transform_indices = @transform_6, window_bounds = array<i64: 16, 64>}, {pipeline_mode = #tpu.pipeline_mode<synchronous>, transform_indices = @transform_7, window_bounds = array<i64: 1, 64>}, {pipeline_mode = #tpu.pipeline_mode<synchronous>, transform_indices = @transform_8, window_bounds = array<i64: 64, 32>}, {pipeline_mode = #tpu.pipeline_mode<synchronous>, transform_indices = @transform_9, window_bounds = array<i64: 1, 32>}, {transform_indices = @transform_10, window_bounds = array<i64: 8, 128>}]} {
    %c0 = arith.constant 0 : index
    %c0_0 = arith.constant 0 : index
    %0 = vector.load %arg1[%c0, %c0_0] : memref<8x32xf32, #tpu.memory_space<vmem>>, vector<8x32xf32>
    %c0_1 = arith.constant 0 : index
    %c0_2 = arith.constant 0 : index
    %1 = vector.load %arg2[%c0_1, %c0_2] : memref<8x16xf32, #tpu.memory_space<vmem>>, vector<8x16xf32>
    %2 = arith.truncf %0 : vector<8x32xf32> to vector<8x32xbf16>
    %c0_3 = arith.constant 0 : index
    %c0_4 = arith.constant 0 : index
    %3 = vector.load %arg3[%c0_3, %c0_4] : memref<32x64xbf16, #tpu.memory_space<vmem>>, vector<32x64xbf16>
    %cst = arith.constant dense<0.000000e+00> : vector<8x64xf32>
    %4 = tpu.matmul %2, %3, %cst {dimension_numbers = #tpu.dot_dimension_numbers<[1], [0], [0], [1], [0, 0, 1, 1], [], []>} : vector<8x32xbf16>, vector<32x64xbf16>, vector<8x64xf32> -> vector<8x64xf32>
    %c0_5 = arith.constant 0 : index
    %c0_6 = arith.constant 0 : index
    %5 = vector.load %arg4[%c0_5, %c0_6] : memref<1x64xf32, #tpu.memory_space<vmem>>, vector<1x64xf32>
    %6 = vector.broadcast %5 : vector<1x64xf32> to vector<8x64xf32>
    %7 = arith.addf %4, %6 : vector<8x64xf32>
    %cst_7 = arith.constant 0.000000e+00 : f32
    %8 = vector.broadcast %cst_7 : f32 to vector<8x64xf32>
    %9 = arith.maximumf %7, %8 : vector<8x64xf32>
    %10 = arith.truncf %9 : vector<8x64xf32> to vector<8x64xbf16>
    %c0_8 = arith.constant 0 : index
    %c0_9 = arith.constant 0 : index
    %11 = vector.load %arg5[%c0_8, %c0_9] : memref<64x32xbf16, #tpu.memory_space<vmem>>, vector<64x32xbf16>
    %cst_10 = arith.constant dense<0.000000e+00> : vector<8x32xf32>
    %12 = tpu.matmul %10, %11, %cst_10 {dimension_numbers = #tpu.dot_dimension_numbers<[1], [0], [0], [1], [0, 0, 1, 1], [], []>} : vector<8x64xbf16>, vector<64x32xbf16>, vector<8x32xf32> -> vector<8x32xf32>
    %c0_11 = arith.constant 0 : index
    %c0_12 = arith.constant 0 : index
    %13 = vector.load %arg6[%c0_11, %c0_12] : memref<1x32xf32, #tpu.memory_space<vmem>>, vector<1x32xf32>
    %14 = vector.broadcast %13 : vector<1x32xf32> to vector<8x32xf32>
    %15 = arith.addf %12, %14 : vector<8x32xf32>
    %16 = vector.extract_strided_slice %15 {offsets = [0, 0], sizes = [8, 16], strides = [1, 1]} : vector<8x32xf32> to vector<8x16xf32>
    %17 = vector.extract_strided_slice %15 {offsets = [0, 16], sizes = [8, 16], strides = [1, 1]} : vector<8x32xf32> to vector<8x16xf32>
    %cst_13 = arith.constant 5.000000e-01 : f32
    %18 = vector.broadcast %cst_13 : f32 to vector<8x16xf32>
    %19 = arith.mulf %18, %17 : vector<8x16xf32>
    %20 = math.exp %19 : vector<8x16xf32>
    %21 = arith.mulf %1, %20 : vector<8x16xf32>
    %22 = arith.addf %16, %21 : vector<8x16xf32>
    %23 = arith.truncf %22 : vector<8x16xf32> to vector<8x16xbf16>
    %c0_14 = arith.constant 0 : index
    %c0_15 = arith.constant 0 : index
    %24 = vector.load %arg7[%c0_14, %c0_15] : memref<16x64xbf16, #tpu.memory_space<vmem>>, vector<16x64xbf16>
    %cst_16 = arith.constant dense<0.000000e+00> : vector<8x64xf32>
    %25 = tpu.matmul %23, %24, %cst_16 {dimension_numbers = #tpu.dot_dimension_numbers<[1], [0], [0], [1], [0, 0, 1, 1], [], []>} : vector<8x16xbf16>, vector<16x64xbf16>, vector<8x64xf32> -> vector<8x64xf32>
    %c0_17 = arith.constant 0 : index
    %c0_18 = arith.constant 0 : index
    %26 = vector.load %arg8[%c0_17, %c0_18] : memref<1x64xf32, #tpu.memory_space<vmem>>, vector<1x64xf32>
    %27 = vector.broadcast %26 : vector<1x64xf32> to vector<8x64xf32>
    %28 = arith.addf %25, %27 : vector<8x64xf32>
    %cst_19 = arith.constant 0.000000e+00 : f32
    %29 = vector.broadcast %cst_19 : f32 to vector<8x64xf32>
    %30 = arith.maximumf %28, %29 : vector<8x64xf32>
    %31 = arith.truncf %30 : vector<8x64xf32> to vector<8x64xbf16>
    %c0_20 = arith.constant 0 : index
    %c0_21 = arith.constant 0 : index
    %32 = vector.load %arg9[%c0_20, %c0_21] : memref<64x32xbf16, #tpu.memory_space<vmem>>, vector<64x32xbf16>
    %cst_22 = arith.constant dense<0.000000e+00> : vector<8x32xf32>
    %33 = tpu.matmul %31, %32, %cst_22 {dimension_numbers = #tpu.dot_dimension_numbers<[1], [0], [0], [1], [0, 0, 1, 1], [], []>} : vector<8x64xbf16>, vector<64x32xbf16>, vector<8x32xf32> -> vector<8x32xf32>
    %c0_23 = arith.constant 0 : index
    %c0_24 = arith.constant 0 : index
    %34 = vector.load %arg10[%c0_23, %c0_24] : memref<1x32xf32, #tpu.memory_space<vmem>>, vector<1x32xf32>
    %35 = vector.broadcast %34 : vector<1x32xf32> to vector<8x32xf32>
    %36 = arith.addf %33, %35 : vector<8x32xf32>
    %37 = arith.negf %36 : vector<8x32xf32>
    %38 = math.exp %37 : vector<8x32xf32>
    %cst_25 = arith.constant 1.000000e+00 : f32
    %39 = vector.broadcast %cst_25 : f32 to vector<8x32xf32>
    %40 = arith.addf %39, %38 : vector<8x32xf32>
    %41 = arith.divf %39, %40 : vector<8x32xf32>
    %cst_26 = arith.constant 0.000000e+00 : f32
    %42 = vector.broadcast %cst_26 : f32 to vector<8x48xf32>
    %43 = tpu.concatenate %15, %22, %41, %42 in 1 : vector<8x32xf32>, vector<8x16xf32>, vector<8x32xf32>, vector<8x48xf32> -> vector<8x128xf32>
    %c0_27 = arith.constant 0 : index
    %c0_28 = arith.constant 0 : index
    %44 = vector.load %arg11[%c0_27, %c0_28] : memref<8x128xf32, #tpu.memory_space<vmem>>, vector<8x128xf32>
    tpu.vector_store %arg11[%c0_27, %c0_28], %43 {strides = array<i32>} : memref<8x128xf32, #tpu.memory_space<vmem>>, vector<8x128xf32>,
    return
  }
  func.func @transform_0(%arg0: i32) -> (i32, i32) {
    %c0_i32 = arith.constant 0 : i32
    %c0_i32_0 = arith.constant 0 : i32
    return %arg0, %c0_i32 : i32, i32
  }
  func.func @transform_1(%arg0: i32) -> (i32, i32) {
    %c0_i32 = arith.constant 0 : i32
    %c0_i32_0 = arith.constant 0 : i32
    return %arg0, %c0_i32 : i32, i32
  }
  func.func @transform_2(%arg0: i32) -> (i32, i32) {
    %c0_i32 = arith.constant 0 : i32
    %c0_i32_0 = arith.constant 0 : i32
    %c0_i32_1 = arith.constant 0 : i32
    return %c0_i32, %c0_i32_0 : i32, i32
  }
  func.func @transform_3(%arg0: i32) -> (i32, i32) {
    %c0_i32 = arith.constant 0 : i32
    %c0_i32_0 = arith.constant 0 : i32
    %c0_i32_1 = arith.constant 0 : i32
    return %c0_i32, %c0_i32_0 : i32, i32
  }
  func.func @transform_4(%arg0: i32) -> (i32, i32) {
    %c0_i32 = arith.constant 0 : i32
    %c0_i32_0 = arith.constant 0 : i32
    %c0_i32_1 = arith.constant 0 : i32
    return %c0_i32, %c0_i32_0 : i32, i32
  }
  func.func @transform_5(%arg0: i32) -> (i32, i32) {
    %c0_i32 = arith.constant 0 : i32
    %c0_i32_0 = arith.constant 0 : i32
    %c0_i32_1 = arith.constant 0 : i32
    return %c0_i32, %c0_i32_0 : i32, i32
  }
  func.func @transform_6(%arg0: i32) -> (i32, i32) {
    %c0_i32 = arith.constant 0 : i32
    %c0_i32_0 = arith.constant 0 : i32
    %c0_i32_1 = arith.constant 0 : i32
    return %c0_i32, %c0_i32_0 : i32, i32
  }
  func.func @transform_7(%arg0: i32) -> (i32, i32) {
    %c0_i32 = arith.constant 0 : i32
    %c0_i32_0 = arith.constant 0 : i32
    %c0_i32_1 = arith.constant 0 : i32
    return %c0_i32, %c0_i32_0 : i32, i32
  }
  func.func @transform_8(%arg0: i32) -> (i32, i32) {
    %c0_i32 = arith.constant 0 : i32
    %c0_i32_0 = arith.constant 0 : i32
    %c0_i32_1 = arith.constant 0 : i32
    return %c0_i32, %c0_i32_0 : i32, i32
  }
  func.func @transform_9(%arg0: i32) -> (i32, i32) {
    %c0_i32 = arith.constant 0 : i32
    %c0_i32_0 = arith.constant 0 : i32
    %c0_i32_1 = arith.constant 0 : i32
    return %c0_i32, %c0_i32_0 : i32, i32
  }
  func.func @transform_10(%arg0: i32) -> (i32, i32) {
    %c0_i32 = arith.constant 0 : i32
    %c0_i32_0 = arith.constant 0 : i32
    return %arg0, %c0_i32 : i32, i32
  }
}

</mosaic_0001>

<bundles_post_ra>
// kernel: tpu_custom_call.1
= control target key start
LH: loop header
LB: loop body
LE: loop exit
PB: predicated region body
PF: predicated region fallthrough
CT: control target
= control target key end

     0   :  { %s496_s0 = inlined_call_operand.vmem [shape: f32[8,32], index: 0, kind: input, shape index: {}]   ;;  %s497_s1 = inlined_call_operand.vmem [shape: f32[8,16], index: 1, kind: input, shape index: {}]   ;;  %s498_s2 = inlined_call_operand.vmem [shape: bf16[32,64], index: 2, kind: input, shape index: {}]   ;;  %s499_s3 = inlined_call_operand.vmem [shape: f32[1,64], index: 3, kind: input, shape index: {}]   ;;  %s500_s4 = inlined_call_operand.vmem [shape: bf16[64,32], index: 4, kind: input, shape index: {}]   ;;  %s501_s5 = inlined_call_operand.vmem [shape: f32[1,32], index: 5, kind: input, shape index: {}]   ;;  %s502_s6 = inlined_call_operand.vmem [shape: bf16[16,64], index: 6, kind: input, shape index: {}]   ;;  %s503_s7 = inlined_call_operand.vmem [shape: f32[1,64], index: 7, kind: input, shape index: {}]   ;;  %s504_s8 = inlined_call_operand.vmem [shape: bf16[64,32], index: 8, kind: input, shape index: {}]   ;;  %s505_s9 = inlined_call_operand.vmem [shape: f32[1,32], index: 9, kind: input, shape index: {}]   ;;  %s506_s10 = inlined_call_operand.hbm [shape: f32[8,128], index: 10, kind: output, shape index: {}]  }
   0x1   :  { %v324_v0 = vld [vmem:[%s498_s2 + $0x8] sm:$0xff]  ;;  %v323_v1 = vld [vmem:[%s498_s2] sm:$0xff]  ;;  %v328_v2 = vld [vmem:[%s500_s4 + $0x18] sm:$0xff] }
   0x2   :  { %70 = vmatpush.bf16.msra.mxu0 %v324_v0  ;;  %v37_v3 = vld [vmem:[%s496_s0] sm:$0xff]  ;;  %123 = vmatpush.bf16.msra.mxu1 %v328_v2  ;;  %v327_v4 = vld [vmem:[%s500_s4 + $0x10] sm:$0xff] }
   0x3   :  { %15 = vsyncpa [#allocation3], 0  ;;  %v39_v5 = vpack.c.bf16 %v37_v3, %v37_v3  ;;  %vm60_vm0 = vcmask 261120   ;;  %v326_v6 = vld [vmem:[%s500_s4 + $0x8] sm:$0xff]  ;;  %v325_v7 = vld [vmem:[%s500_s4] sm:$0xff]  ;;  %vm115_vm1 = vcmask 523264  }
   0x4   :  { %v338_v8 = vld [vmem:[%s499_s3] ss:$0 sm:$0xff]  ;;  %s374_s3 = smov 112   ;;  %vm154_vm2 = vcmask 130048   ;;  %v333_v27 = vld [vmem:[%s504_s8 + $0x18] sm:$0xff]  ;;  %v332_v28 = vld [vmem:[%s504_s8 + $0x10] sm:$0xff] }
   0x5   :  { %v339_v14 = vld [vmem:[%s501_s5] ss:$0 sm:$0xff]  ;;  %s375_s5 = smov 32   ;;  %216 = vmatpush.bf16.msra.mxu3 %v333_v27  ;;  %v331_v29 = vld [vmem:[%s504_s8 + $0x8] sm:$0xff]  ;;  %vm253_vm7 = vcmask 392192   ;;  %s265_s23 = sshll.u32 %s506_s10, 4  ;;  %s266_s23 = int_to_ptr.hbm [resolvable:$true] %s265_s23 }
   0x6   :  { %71 = vmatpush.bf16.msra.mxu0 %v323_v1  ;;  %124 = vmatpush.bf16.msra.mxu1 %v327_v4  ;;  %v329_v21 = vld [vmem:[%s502_s6] sm:$0xff]  ;;  %vm255_vm8 = vcmask 654336  }
   0x7   :  { %165 = vmatpush.bf16.msra.mxu2 %v329_v21  ;;  %v38_v22 = vld [vmem:[%s497_s1] sm:$0xff] }
   0x8   :  { %v330_v30 = vld [vmem:[%s504_s8] sm:$0xff]  ;;  %s377_s8 = smov [#allocation2]  }
   0x9   :  { %282 = vmatmul.msk.bf16.vlgmr.msra.gmra.mxu0 %vm60_vm0, %v39_v5  ;;  %217 = vmatpush.bf16.msra.mxu3 %v332_v28  ;;  %v340_v31 = vld [vmem:[%s503_s7] ss:$0 sm:$0xff]  ;;  %s376_s7 = smov 48  }
   0xa   :  { %125 = vmatpush.bf16.msra.mxu1 %v326_v6  ;;  %v341_v37 = vld [vmem:[%s505_s9] ss:$0 sm:$0xff]  ;;  %s263_s9 = sshll.u32 %s377_s8, 4  ;;  %s264_s9 = int_to_ptr.vmem [resolvable:$true] %s263_s9 }
   0xd   :  { %218 = vmatpush.bf16.msra.mxu3 %v331_v29 }
   0xe   :  { %126 = vmatpush.bf16.msra.mxu1 %v325_v7 }
  0x11   :  { %219 = vmatpush.bf16.msra.mxu3 %v330_v30 }
  0x86   :  { %v73_v9 = vpop.f32.mrf.mxu0 }
  0x87   :  { %v74_v10 = vadd.f32 %v338_v8, %v73_v9 }
  0x89   :  { %v77_v11 = vmax.f32 %v74_v10, 0.0 }
  0x8b   :  { %v78_v12 = vpack.c.bf16 %v77_v11, %v77_v11 }
  0x8d   :  { %299 = vmatmul.msk.bf16.vlgmr.msra.gmra.mxu1 %vm115_vm1, %v78_v12 }
  0x8e   :  { %v75_v13 = vpop.f32.mrf.mxu0 }
 0x10a   :  { %v128_v15 = vpop.f32.mrf.mxu1 }
 0x10b   :  { %v462_v16 = vadd.f32 %v339_v14, %v128_v15 }
 0x10d   :  { %v132_v17 = vmul.f32 0.5, %v462_v16 }
 0x10f   :  { %v133_v18 = vmul.f32 1.442695, %v132_v17 }
 0x111   :  { %342 = vpow2.f32 %v133_v18 }
 0x112   :  { %v130_v19 = vpop.f32.mrf.mxu1 }
 0x117   :  { %v343_v20 = vpop.eup %342 }
 0x118   :  { %136 = vrot.lane.b32.xlu0 %v343_v20, %s374_s3 }
 0x18a   :  { %v137_v23 = vpop.permute.xlu0 %136 }
 0x18b   :  { %v139_v24 = vmul.f32 %v137_v23, %v38_v22 }
 0x18d   :  { %v140_v25 = vadd.f32 %v139_v24, %v462_v16 }
 0x18f   :  { %245 = vrot.lane.b32.xlu0 %v140_v25, %s375_s5  ;;  %v141_v26 = vpack.c.bf16 %v140_v25, %v140_v25 }
 0x191   :  { %304 = vmatmul.msk.bf16.vlgmr.msra.gmra.mxu2 %vm154_vm2, %v141_v26 }
 0x201   :  { %v246_v54 = vpop.permute.xlu0 %245 }
 0x202   :  { %v252_v55 = vsel %vm60_vm0, %v462_v16, %v246_v54 }
 0x214   :  { %v167_v32 = vpop.f32.mrf.mxu2 }
 0x215   :  { %v168_v33 = vadd.f32 %v340_v31, %v167_v32 }
 0x217   :  { %v171_v34 = vmax.f32 %v168_v33, 0.0 }
 0x219   :  { %v172_v35 = vpack.c.bf16 %v171_v34, %v171_v34 }
 0x21b   :  { %321 = vmatmul.msk.bf16.vlgmr.msra.gmra.mxu3 %vm115_vm1, %v172_v35 }
 0x21c   :  { %v169_v36 = vpop.f32.mrf.mxu2 }
 0x29e   :  { %v221_v38 = vpop.f32.mrf.mxu3 }
 0x29f   :  { %v222_v39 = vadd.f32 %v341_v37, %v221_v38 }
 0x2a1   :  { %v322_v40 = vmul.f32 -1.442695, %v222_v39 }
 0x2a3   :  { %344 = vpow2.f32 %v322_v40 }
 0x2a6   :  { %v223_v41 = vpop.f32.mrf.mxu3 }
 0x2a9   :  { %v345_v42 = vpop.eup %344 }
 0x2aa   :  { %v228_v43 = vadd.f32 1.0, %v345_v42 }
 0x2ac   :  { %346 = vrcp.f32 %v228_v43  ;;  %v240_v47 = vand.u32 2147483648, %v228_v43  ;;  %v238_v49 = vand.u32 2147483647, %v228_v43  ;;  %vm234_vm4 = vweird.f32 %v228_v43 }
 0x2ae   :  { %v241_v51 = vor.u32 1.1754944e-38, %v240_v47  ;;  %vm239_vm6 = vcmp.eq.f32.partialorder %v238_v49, 8.507059e+37 }
 0x2b2   :  { %v347_v44 = vpop.eup %346 }
 0x2b3   :  { %v230_v45 = vmul.f32 %v347_v44, %v228_v43  ;;  %vm235_vm3 = vweird.f32 %v347_v44 }
 0x2b4   :  { %vm236_vm5 = vmor %vm234_vm4, %vm235_vm3 }
 0x2b5   :  { %v231_v46 = vsub.f32 1.0, %v230_v45 }
 0x2b7   :  { %v232_v48 = vmul.f32 %v347_v44, %v231_v46 }
 0x2b9   :  { %v233_v50 = vadd.f32 %v347_v44, %v232_v48 }
 0x2bb   :  { %v237_v52 = vsel %vm236_vm5, %v347_v44, %v233_v50 }
 0x2bc   :  { %v242_v53 = vsel %vm239_vm6, %v241_v51, %v237_v52 }
 0x2bd   :  { %249 = vrot.lane.b32.xlu1 %v242_v53, %s376_s7 }
 0x32f   :  { %v250_v56 = vpop.permute.xlu1 %249 }
 0x330   :  { %v254_v57 = vsel %vm253_vm7, %v252_v55, %v250_v56 }
 0x331   :  { %v256_v58 = vsel %vm255_vm8, %v254_v57, 0.0 }
 0x332   :  { %257 = vst [vmem:[#allocation2] sm:$0xff] %v256_v58 }
 0x333   :  { %268 = dma.vmem_to_hbm [thread:$0]  %s264_s9, 128, %s266_s23, [#allocation3]  }
 0x334   :  { %372 = dma.done.wait [#allocation3], 128  }
 0x335   :  { %373 = vsyncadd [#allocation3], 4294967168 }
 0x336   :  { %273 = vsyncpa [#allocation3], 1 }

</bundles_post_ra>
